<compile_context>
chip_gen: v6e
topology: v6e:2x2x1
jax: 0.10.0
libtpu: 0.0.40
codegen_flags: <defaults>
</compile_context>

<pallas_src>
import functools
import math

import jax
import jax.numpy as jnp
from jax.experimental import pallas as pl
from jax.experimental.pallas import tpu as pltpu


# ----------------------------- helpers --------------------------------------

def _round_up(x, m):
    return ((x + m - 1) // m) * m


# ----------------------------- Pallas kernels -------------------------------

def _matmul_epi_kernel(*refs, relu, has_residual):
    """bf16 MXU matmul, K-tiled f32 accumulation, fused affine(+res)(+ReLU) epilogue.

    Grid = (M tiles, N tiles, K tiles); K is the last ('arbitrary') axis."""
    if has_residual:
        a_ref, b_ref, s_ref, t_ref, r_ref, o_ref, acc_ref = refs
    else:
        a_ref, b_ref, s_ref, t_ref, o_ref, acc_ref = refs
        r_ref = None

    @pl.when(pl.program_id(2) == 0)
    def _():
        acc_ref[...] = jnp.zeros_like(acc_ref)

    acc_ref[...] += jnp.dot(a_ref[...], b_ref[...],
                            preferred_element_type=jnp.float32)

    @pl.when(pl.program_id(2) == pl.num_programs(2) - 1)
    def _():
        y = acc_ref[...] * s_ref[...] + t_ref[...]
        if has_residual:
            y = y + r_ref[...]
        if relu:
            y = jnp.maximum(y, 0.0)
        o_ref[...] = y.astype(o_ref.dtype)


def _max3_kernel(a_ref, b_ref, c_ref, o_ref):
    o_ref[...] = jnp.maximum(jnp.maximum(a_ref[...], b_ref[...]), c_ref[...])


def _gam_gate_kernel(s_ref, c_ref, so_ref, co_ref):
    """score_feat = s + sigmoid(c)*s ; classify_feat = c + sigmoid(s)*c."""
    s = s_ref[...]
    c = c_ref[...]
    so_ref[...] = s + jax.nn.sigmoid(c) * s
    co_ref[...] = c + jax.nn.sigmoid(s) * c


def _pam_kernel(q_ref, k_ref, v_ref, x_ref, g_ref, o_ref):
    """Per-batch position attention: softmax(Q K^T) V, then gamma*out + x."""
    # TODO(synk): tile over keys/values (flash-style online softmax) for large HW.
    q = q_ref[0]          # (HW, Cq)
    k = k_ref[0]          # (HW, Cq)
    v = v_ref[0]          # (HW, C)
    energy = jax.lax.dot_general(q, k, (((1,), (1,)), ((), ())),
                                 preferred_element_type=jnp.float32)   # (HW, HW)
    energy = energy - jnp.max(energy, axis=-1, keepdims=True)
    e = jnp.exp(energy)
    denom = jnp.sum(e, axis=-1, keepdims=True)
    out = jnp.dot(e, v, preferred_element_type=jnp.float32)            # (HW, C)
    out = out * pl.reciprocal(denom, approx=True)   # normalize post-@V (HW*C elems)
    o_ref[0] = g_ref[0] * out + x_ref[0]


def _pool_fc_kernel(x_ref, w_ref, b_ref, o_ref):
    """x: (B, HW, C); mean over HW then linear -> (B, num_out)."""
    hw = x_ref.shape[1]
    pooled = jnp.sum(x_ref[...], axis=1) * (1.0 / hw)
    o_ref[...] = jnp.dot(pooled, w_ref[...],
                         preferred_element_type=jnp.float32) + b_ref[...]


# ------------------------------ Pallas wrappers -----------------------------

def matmul_affine(a, b, scale, shift, residual=None, relu=False):
    """(M,K)@(K,N) with fused y = [relu](acc*scale + shift [+ residual]).

    Operands are cast to bf16 for the MXU; accumulation and output are f32."""
    M, K = a.shape
    K2, N = b.shape
    assert K == K2

    Kp = _round_up(K, 128)
    tk = next(t for t in (512, 384, 256, 128) if Kp % t == 0)
    Np = _round_up(N, 128)
    tn = 256 if Np % 256 == 0 else 128
    tn = min(tn, Np)
    Mp = _round_up(M, 8)
    if Mp > 256:
        tm = 256
        Mp = _round_up(M, tm)
    else:
        tm = Mp

    a_p = jnp.pad(a.astype(jnp.bfloat16), ((0, Mp - M), (0, Kp - K)))
    b_p = jnp.pad(b.astype(jnp.bfloat16), ((0, Kp - K), (0, Np - N)))
    s_p = jnp.pad(scale.astype(jnp.float32).reshape(1, N), ((0, 0), (0, Np - N)))
    t_p = jnp.pad(shift.astype(jnp.float32).reshape(1, N), ((0, 0), (0, Np - N)))

    in_arrays = [a_p, b_p, s_p, t_p]
    in_specs = [
        pl.BlockSpec((tm, tk), lambda i, j, k: (i, k)),
        pl.BlockSpec((tk, tn), lambda i, j, k: (k, j)),
        pl.BlockSpec((1, tn), lambda i, j, k: (0, j)),
        pl.BlockSpec((1, tn), lambda i, j, k: (0, j)),
    ]
    has_res = residual is not None
    if has_res:
        r_p = jnp.pad(residual.astype(jnp.float32), ((0, Mp - M), (0, Np - N)))
        in_arrays.append(r_p)
        in_specs.append(pl.BlockSpec((tm, tn), lambda i, j, k: (i, j)))

    out = pl.pallas_call(
        functools.partial(_matmul_epi_kernel, relu=relu, has_residual=has_res),
        out_shape=jax.ShapeDtypeStruct((Mp, Np), jnp.float32),
        grid_spec=pltpu.PrefetchScalarGridSpec(
            num_scalar_prefetch=0,
            grid=(Mp // tm, Np // tn, Kp // tk),
            in_specs=in_specs,
            out_specs=pl.BlockSpec((tm, tn), lambda i, j, k: (i, j)),
            scratch_shapes=[pltpu.VMEM((tm, tn), jnp.float32)]),
        compiler_params=pltpu.CompilerParams(
            dimension_semantics=("parallel", "parallel", "arbitrary"),
            vmem_limit_bytes=48 * 1024 * 1024),
    )(*in_arrays)
    return out[:M, :N]


def im2col(x, kh, kw, stride, pad):
    """x: (B, H, W, C) -> patches (B, Ho, Wo, kh*kw, C)."""
    B, H, W, C = x.shape
    xp = jnp.pad(x, ((0, 0), (pad, pad), (pad, pad), (0, 0)))
    Ho = (H + 2 * pad - kh) // stride + 1
    Wo = (W + 2 * pad - kw) // stride + 1
    cols = []
    for i in range(kh):
        for j in range(kw):
            cols.append(xp[:, i:i + stride * Ho:stride, j:j + stride * Wo:stride, :])
    return jnp.stack(cols, axis=3)


def conv_bn(x, w, scale=None, shift=None, residual=None, relu=False,
            stride=1, pad=0):
    """NHWC conv (weight (kh,kw,cin,cout) bf16, no bias) with folded-BN affine,
    optional residual add and ReLU fused into the matmul epilogue."""
    kh, kw, cin, cout = w.shape
    if scale is None:
        scale = jnp.ones((cout,), jnp.float32)
    if shift is None:
        shift = jnp.zeros((cout,), jnp.float32)
    if kh == 1 and kw == 1 and pad == 0:
        xs = x[:, ::stride, ::stride, :]
        B, Ho, Wo, _ = xs.shape
        a2 = xs.reshape(-1, cin)
    else:
        # TODO(synk): fold the kh*kw taps into the K-reduction grid (shifted
        # index_maps) instead of materializing bf16 im2col patches in HBM.
        patches = im2col(x.astype(jnp.bfloat16), kh, kw, stride, pad)
        B, Ho, Wo, P, C = patches.shape
        a2 = patches.reshape(B * Ho * Wo, P * C)
    w2 = w.reshape(kh * kw * cin, cout)
    r2 = residual.reshape(-1, cout) if residual is not None else None
    y = matmul_affine(a2, w2, scale, shift, residual=r2, relu=relu)
    return y.reshape(B, Ho, Wo, cout)


def _max3(xs):
    """Elementwise max of 3 equal-shape arrays, row-blocked and lane-dense."""
    shape = xs[0].shape
    total = math.prod(shape)
    cols = 128 if total % 128 == 0 else shape[-1]
    rows = total // cols
    flat = [x.reshape(rows, cols) for x in xs]
    rp = _round_up(rows, 8)
    tr = min(512, rp)
    rp = _round_up(rows, tr)
    flat = [jnp.pad(f, ((0, rp - rows), (0, 0))) for f in flat]
    out = pl.pallas_call(
        _max3_kernel,
        out_shape=jax.ShapeDtypeStruct((rp, cols), jnp.float32),
        grid=(rp // tr,),
        in_specs=[pl.BlockSpec((tr, cols), lambda i: (i, 0))] * 3,
        out_specs=pl.BlockSpec((tr, cols), lambda i: (i, 0)),
        compiler_params=pltpu.CompilerParams(
            dimension_semantics=("parallel",)),
    )(*flat)
    return out[:rows].reshape(shape)


def maxpool_3x3_s2(x):
    """3x3 / stride-2 / pad-1 max pool, done separably (W pass then H pass) so
    the input is never 9x-duplicated + transposed in HBM."""
    B, H, W, C = x.shape
    Ho = (H + 2 - 3) // 2 + 1
    Wo = (W + 2 - 3) // 2 + 1
    neg = jnp.array(-jnp.inf, x.dtype)
    xp = jnp.pad(x, ((0, 0), (0, 0), (1, 1), (0, 0)), constant_values=neg)
    xw = _max3([xp[:, :, j:j + 2 * Wo:2, :] for j in range(3)])      # (B, H, Wo, C)
    xp2 = jnp.pad(xw, ((0, 0), (1, 1), (0, 0), (0, 0)), constant_values=neg)
    return _max3([xp2[:, i:i + 2 * Ho:2, :, :] for i in range(3)])   # (B, Ho, Wo, C)


def gam_gate(s, c):
    B, H, W, C = s.shape
    rows = B * H * W
    s2 = s.reshape(rows, C)
    c2 = c.reshape(rows, C)
    rp = _round_up(rows, 8)
    tr = min(512, rp)
    rp = _round_up(rows, tr)
    s2 = jnp.pad(s2, ((0, rp - rows), (0, 0)))
    c2 = jnp.pad(c2, ((0, rp - rows), (0, 0)))
    sf, cf = pl.pallas_call(
        _gam_gate_kernel,
        out_shape=(jax.ShapeDtypeStruct((rp, C), jnp.float32),
                   jax.ShapeDtypeStruct((rp, C), jnp.float32)),
        grid=(rp // tr,),
        in_specs=[pl.BlockSpec((tr, C), lambda i: (i, 0))] * 2,
        out_specs=[pl.BlockSpec((tr, C), lambda i: (i, 0))] * 2,
        compiler_params=pltpu.CompilerParams(
            dimension_semantics=("parallel",)),
    )(s2, c2)
    return (sf[:rows].reshape(B, H, W, C), cf[:rows].reshape(B, H, W, C))


def gam_module(x, p):
    """Gate attention module on the 2048-channel layer4 features."""
    s = conv_bn(x, p["score_w1"], p["score_s"], p["score_b"], stride=1, pad=1)
    s = conv_bn(s, p["score_w2"])
    c = conv_bn(x, p["cls_w1"], p["cls_s"], p["cls_b"], stride=1, pad=1)
    c = conv_bn(c, p["cls_w2"])
    return gam_gate(s, c)


def pam_module(x, p):
    """Position attention module; x: (B, H, W, C) NHWC."""
    B, H, W, C = x.shape
    HW = H * W
    cq = C // 8
    x2 = x.reshape(B * HW, C)
    # Fused [Q | K | V] projection: one pass over x2 instead of three.
    qkv = matmul_affine(x2, p["wqkv"],
                        jnp.ones((2 * cq + C,), jnp.float32), p["bqkv"])
    q = qkv[:, :cq].reshape(B, HW, cq)
    k = qkv[:, cq:2 * cq].reshape(B, HW, cq)
    v = qkv[:, 2 * cq:].reshape(B, HW, C)
    out = pl.pallas_call(
        _pam_kernel,
        out_shape=jax.ShapeDtypeStruct((B, HW, C), jnp.float32),
        grid=(B,),
        in_specs=[pl.BlockSpec((1, HW, cq), lambda b: (b, 0, 0)),
                  pl.BlockSpec((1, HW, cq), lambda b: (b, 0, 0)),
                  pl.BlockSpec((1, HW, C), lambda b: (b, 0, 0)),
                  pl.BlockSpec((1, HW, C), lambda b: (b, 0, 0)),
                  pl.BlockSpec(memory_space=pltpu.MemorySpace.SMEM)],
        out_specs=pl.BlockSpec((1, HW, C), lambda b: (b, 0, 0)),
        compiler_params=pltpu.CompilerParams(
            dimension_semantics=("arbitrary",)),
    )(q, k, v, x.reshape(B, HW, C), p["gamma"])
    return out.reshape(B, H, W, C)


def pool_fc(x, w, b):
    """AdaptiveAvgPool2d((1,1)) + flatten + Linear, fused (no transpose)."""
    B, H, W, C = x.shape
    return pl.pallas_call(
        _pool_fc_kernel,
        out_shape=jax.ShapeDtypeStruct((B, w.shape[1]), jnp.float32),
    )(x.reshape(B, H * W, C), w, b.reshape(1, -1))


def bottleneck(x, p):
    s = p["stride"]
    out = conv_bn(x, p["w1"], p["s1"], p["b1"], relu=True)
    out = conv_bn(out, p["w2"], p["s2"], p["b2"], relu=True, stride=s, pad=1)
    if "wd" in p:
        identity = conv_bn(x, p["wd"], p["sd"], p["bd"], stride=s)
    else:
        identity = x
    # conv3 + BN3 + residual add + ReLU fused in one epilogue.
    return conv_bn(out, p["w3"], p["s3"], p["b3"], residual=identity, relu=True)


def scnet_forward(params, x_nchw):
    x = jnp.transpose(x_nchw, (0, 2, 3, 1)).astype(jnp.float32)  # NCHW -> NHWC
    x = conv_bn(x, params["conv1"], params["bn1_s"], params["bn1_b"],
                relu=True, stride=2, pad=3)
    x = maxpool_3x3_s2(x)
    for li in range(1, 5):
        for blk in params[f"layer{li}"]:
            x = bottleneck(x, blk)
    score_ga, cls_ga = gam_module(x, params["gam"])
    score_pa = pam_module(score_ga, params["pam_score"])
    cls_pa = pam_module(cls_ga, params["pam_classify"])
    y_score = pool_fc(score_pa, params["fc_score_w"], params["fc_score_b"])
    y_classify = pool_fc(cls_pa, params["fc_classify_w"], params["fc_classify_b"])
    return y_score, y_classify


# ----------------------------- parameter init -------------------------------

class KeyGen:
    def __init__(self, seed):
        self._key = jax.random.PRNGKey(seed)

    def __call__(self):
        self._key, sub = jax.random.split(self._key)
        return sub


def conv_w(kg, kh, kw, cin, cout):
    std = math.sqrt(2.0 / (kh * kw * cout))  # kaiming_normal_, fan_out, relu
    w = jax.random.normal(kg(), (kh, kw, cin, cout), jnp.float32) * std
    return w.astype(jnp.bfloat16)            # pre-cast once for the MXU


def bn_params(c):
    # inference-mode BN folded to per-channel affine (gamma=1, beta=0, running stats)
    scale = jnp.full((c,), 1.0 / math.sqrt(1.0 + 1e-5), jnp.float32)
    shift = jnp.zeros((c,), jnp.float32)
    return scale, shift


def pam_params(kg, c):
    cq = c // 8
    std = 1.0 / math.sqrt(c)
    wq = jax.random.normal(kg(), (c, cq), jnp.float32) * std
    wk = jax.random.normal(kg(), (c, cq), jnp.float32) * std
    wv = jax.random.normal(kg(), (c, c), jnp.float32) * std
    bq = jax.random.normal(kg(), (cq,), jnp.float32) * 0.01
    bk = jax.random.normal(kg(), (cq,), jnp.float32) * 0.01
    bv = jax.random.normal(kg(), (c,), jnp.float32) * 0.01
    return {
        "wqkv": jnp.concatenate([wq, wk, wv], axis=1).astype(jnp.bfloat16),
        "bqkv": jnp.concatenate([bq, bk, bv], axis=0),
        "gamma": jnp.zeros((1,), jnp.float32),  # matches nn.Parameter(torch.zeros(1))
    }


def init_params(seed=42, num_scores=4, num_classes=4):
    kg = KeyGen(seed)
    p = {}
    p["conv1"] = conv_w(kg, 7, 7, 3, 64)
    p["bn1_s"], p["bn1_b"] = bn_params(64)

    in_c = 64
    blocks_num = (1, 1, 1, 1)  # TODO(synk): ResNet-50 uses (3,4,6,3); kept small for the demo
    for li, (channel, nblk, stride) in enumerate(
            zip((64, 128, 256, 512), blocks_num, (1, 2, 2, 2)), start=1):
        blocks = []
        for bi in range(nblk):
            s = stride if bi == 0 else 1
            width = channel  # groups=1, width_per_group=64
            blk = {"stride": s}
            blk["w1"] = conv_w(kg, 1, 1, in_c, width)
            blk["s1"], blk["b1"] = bn_params(width)
            blk["w2"] = conv_w(kg, 3, 3, width, width)
            blk["s2"], blk["b2"] = bn_params(width)
            blk["w3"] = conv_w(kg, 1, 1, width, channel * 4)
            blk["s3"], blk["b3"] = bn_params(channel * 4)
            if s != 1 or in_c != channel * 4:
                blk["wd"] = conv_w(kg, 1, 1, in_c, channel * 4)
                blk["sd"], blk["bd"] = bn_params(channel * 4)
            in_c = channel * 4
            blocks.append(blk)
        p[f"layer{li}"] = blocks

    gam = {
        "score_w1": conv_w(kg, 3, 3, 2048, 512),
        "score_w2": conv_w(kg, 1, 1, 512, 256),
        "cls_w1": conv_w(kg, 3, 3, 2048, 512),
        "cls_w2": conv_w(kg, 1, 1, 512, 256),
    }
    gam["score_s"], gam["score_b"] = bn_params(512)
    gam["cls_s"], gam["cls_b"] = bn_params(512)
    p["gam"] = gam

    p["pam_score"] = pam_params(kg, 256)
    p["pam_classify"] = pam_params(kg, 256)

    fc_std = 1.0 / math.sqrt(256)
    p["fc_score_w"] = jax.random.normal(kg(), (256, num_scores), jnp.float32) * fc_std
    p["fc_score_b"] = jnp.zeros((num_scores,), jnp.float32)
    p["fc_classify_w"] = jax.random.normal(kg(), (256, num_classes), jnp.float32) * fc_std
    p["fc_classify_b"] = jnp.zeros((num_classes,), jnp.float32)
    return p


# ---------------------------------- main ------------------------------------

if __name__ == "__main__":
    params = init_params(seed=42)
    # Input in NCHW like the PyTorch module: (B, 3, H, W). 64x64 -> layer4 is 2x2.
    x = jax.random.normal(jax.random.PRNGKey(0), (2, 3, 64, 64), jnp.float32)

    y_score, y_classify = scnet_forward(params, x)
    jax.block_until_ready((y_score, y_classify))

    assert y_score.shape == (2, 4), y_score.shape
    assert y_classify.shape == (2, 4), y_classify.shape
    assert jnp.all(jnp.isfinite(y_score)) and jnp.all(jnp.isfinite(y_classify))
    print("KERNEL_OK")
</pallas_src>

<mosaic_0001>
module attributes {stable_mosaic.version = 11 : i64} {
  func.func @_matmul_epi_kernel(%arg0: i32, %arg1: i32, %arg2: i32, %arg3: memref<256x256xbf16, #tpu.memory_space<vmem>>, %arg4: memref<256x128xbf16, #tpu.memory_space<vmem>>, %arg5: memref<1x128xf32, #tpu.memory_space<vmem>>, %arg6: memref<1x128xf32, #tpu.memory_space<vmem>>, %arg7: memref<256x128xf32, #tpu.memory_space<vmem>>, %arg8: memref<256x128xf32, #tpu.memory_space<vmem>>) attributes {dimension_semantics = [#tpu.dimension_semantics<parallel>, #tpu.dimension_semantics<parallel>, #tpu.dimension_semantics<arbitrary>], iteration_bounds = array<i64: 8, 1, 1>, scalar_prefetch = 0 : i64, scratch_operands = 1 : i64, tpu.core_type = #tpu.core_type<tc>, window_params = [{transform_indices = @transform_0, window_bounds = array<i64: 256, 256>}, {transform_indices = @transform_1, window_bounds = array<i64: 256, 128>}, {transform_indices = @transform_2, window_bounds = array<i64: 1, 128>}, {transform_indices = @transform_3, window_bounds = array<i64: 1, 128>}, {transform_indices = @transform_4, window_bounds = array<i64: 256, 128>}]} {
    %c0_i32 = arith.constant 0 : i32
    %0 = arith.cmpi eq, %arg2, %c0_i32 : i32
    %1 = arith.extui %0 : i1 to i32
    %c0_i32_0 = arith.constant 0 : i32
    %2 = arith.cmpi ne, %1, %c0_i32_0 : i32
    scf.if %2 {
      %cst_10 = arith.constant 0.000000e+00 : f32
      %12 = vector.broadcast %cst_10 : f32 to vector<256x128xf32>
      %c0_11 = arith.constant 0 : index
      %c0_12 = arith.constant 0 : index
      %13 = vector.load %arg8[%c0_11, %c0_12] : memref<256x128xf32, #tpu.memory_space<vmem>>, vector<256x128xf32>
      tpu.vector_store %arg8[%c0_11, %c0_12], %12 {strides = array<i32>} : memref<256x128xf32, #tpu.memory_space<vmem>>, vector<256x128xf32>,
    } else {
    }
    %c0 = arith.constant 0 : index
    %c0_1 = arith.constant 0 : index
    %3 = vector.load %arg8[%c0, %c0_1] : memref<256x128xf32, #tpu.memory_space<vmem>>, vector<256x128xf32>
    %c0_2 = arith.constant 0 : index
    %c0_3 = arith.constant 0 : index
    %4 = vector.load %arg3[%c0_2, %c0_3] : memref<256x256xbf16, #tpu.memory_space<vmem>>, vector<256x256xbf16>
    %c0_4 = arith.constant 0 : index
    %c0_5 = arith.constant 0 : index
    %5 = vector.load %arg4[%c0_4, %c0_5] : memref<256x128xbf16, #tpu.memory_space<vmem>>, vector<256x128xbf16>
    %cst = arith.constant dense<0.000000e+00> : vector<256x128xf32>
    %6 = tpu.matmul %4, %5, %cst {dimension_numbers = #tpu.dot_dimension_numbers<[1], [0], [0], [1], [0, 0, 1, 1], [], []>} : vector<256x256xbf16>, vector<256x128xbf16>, vector<256x128xf32> -> vector<256x128xf32>
    %7 = arith.addf %3, %6 : vector<256x128xf32>
    %c0_6 = arith.constant 0 : index
    %c0_7 = arith.constant 0 : index
    %8 = vector.load %arg8[%c0_6, %c0_7] : memref<256x128xf32, #tpu.memory_space<vmem>>, vector<256x128xf32>
    tpu.vector_store %arg8[%c0_6, %c0_7], %7 {strides = array<i32>} : memref<256x128xf32, #tpu.memory_space<vmem>>, vector<256x128xf32>,
    %c0_i32_8 = arith.constant 0 : i32
    %9 = arith.cmpi eq, %arg2, %c0_i32_8 : i32
    %10 = arith.extui %9 : i1 to i32
    %c0_i32_9 = arith.constant 0 : i32
    %11 = arith.cmpi ne, %10, %c0_i32_9 : i32
    scf.if %11 {
      %c0_10 = arith.constant 0 : index
      %c0_11 = arith.constant 0 : index
      %12 = vector.load %arg8[%c0_10, %c0_11] : memref<256x128xf32, #tpu.memory_space<vmem>>, vector<256x128xf32>
      %c0_12 = arith.constant 0 : index
      %c0_13 = arith.constant 0 : index
      %13 = vector.load %arg5[%c0_12, %c0_13] : memref<1x128xf32, #tpu.memory_space<vmem>>, vector<1x128xf32>
      %14 = vector.broadcast %13 : vector<1x128xf32> to vector<256x128xf32>
      %15 = arith.mulf %12, %14 : vector<256x128xf32>
      %c0_14 = arith.constant 0 : index
      %c0_15 = arith.constant 0 : index
      %16 = vector.load %arg6[%c0_14, %c0_15] : memref<1x128xf32, #tpu.memory_space<vmem>>, vector<1x128xf32>
      %17 = vector.broadcast %16 : vector<1x128xf32> to vector<256x128xf32>
      %18 = arith.addf %15, %17 : vector<256x128xf32>
      %cst_16 = arith.constant 0.000000e+00 : f32
      %19 = vector.broadcast %cst_16 : f32 to vector<256x128xf32>
      %20 = arith.maximumf %18, %19 : vector<256x128xf32>
      %c0_17 = arith.constant 0 : index
      %c0_18 = arith.constant 0 : index
      %21 = vector.load %arg7[%c0_17, %c0_18] : memref<256x128xf32, #tpu.memory_space<vmem>>, vector<256x128xf32>
      tpu.vector_store %arg7[%c0_17, %c0_18], %20 {strides = array<i32>} : memref<256x128xf32, #tpu.memory_space<vmem>>, vector<256x128xf32>,
    } else {
    }
    return
  }
  func.func @transform_0(%arg0: i32, %arg1: i32, %arg2: i32) -> (i32, i32) {
    %c0_i32 = arith.constant 0 : i32
    return %arg0, %arg2 : i32, i32
  }
  func.func @transform_1(%arg0: i32, %arg1: i32, %arg2: i32) -> (i32, i32) {
    %c0_i32 = arith.constant 0 : i32
    return %arg2, %arg1 : i32, i32
  }
  func.func @transform_2(%arg0: i32, %arg1: i32, %arg2: i32) -> (i32, i32) {
    %c0_i32 = arith.constant 0 : i32
    %c0_i32_0 = arith.constant 0 : i32
    return %c0_i32, %arg1 : i32, i32
  }
  func.func @transform_3(%arg0: i32, %arg1: i32, %arg2: i32) -> (i32, i32) {
    %c0_i32 = arith.constant 0 : i32
    %c0_i32_0 = arith.constant 0 : i32
    return %c0_i32, %arg1 : i32, i32
  }
  func.func @transform_4(%arg0: i32, %arg1: i32, %arg2: i32) -> (i32, i32) {
    %c0_i32 = arith.constant 0 : i32
    return %arg0, %arg1 : i32, i32
  }
}

</mosaic_0001>

<bundles_post_ra>
// kernel: tpu_custom_call.1
= control target key start
LH: loop header
LB: loop body
LE: loop exit
PB: predicated region body
PF: predicated region fallthrough
CT: control target
= control target key end

     0   :  { %s2077_s0 = inlined_call_operand.hbm [shape: bf16[2048,256], index: 0, kind: input, shape index: {}]   ;;  %s2078_s1 = inlined_call_operand.hbm [shape: bf16[256,128], index: 1, kind: input, shape index: {}]   ;;  %s2079_s2 = inlined_call_operand.vmem [shape: f32[1,128], index: 2, kind: input, shape index: {}]   ;;  %s2080_s3 = inlined_call_operand.vmem [shape: f32[1,128], index: 3, kind: input, shape index: {}]   ;;  %s2081_s4 = inlined_call_operand.hbm [shape: f32[2048,128], index: 4, kind: output, shape index: {}]  }
   0x1   :  { %2083 = sst [smem:[#allocation12_spill]] %s2078_s1 }
   0x2   :  { %9 = vsyncpa [#allocation4], 0 }
   0x3   :  { %11 = vsyncpa [#allocation4 + $0x1], 0 }
   0x4   :  { %12 = vsyncpa [#allocation7], 0 }
   0x5   :  { %13 = vsyncpa [#allocation5], 0 }
   0x6   :  { %15 = vsyncpa [#allocation5 + $0x1], 0  ;;  %s1751_s15 = smov 0   ;;  %s1753_s16 = smov 0  }
   0x7   :  { %s1755_s17 = smov 0   ;;  %s1757_s18 = smov 0  }
   0x8   :  { %s1759_s19 = smov 0   ;;  %s1761_s20 = smov 0  }
   0x9 LB: > { %s1233_s21 = sadd.s32 4294967295, %s1715_s20   ;;  %s1234_s22 = sadd.s32 4294967294, %s1715_s20   ;;  %s1715_s20 = sphi %s1761_s20, %s21_s20   ;;  %s1711_s19 = sphi %s1759_s19, %s2100_s19   ;;  %s1707_s18 = sphi %s1757_s18, %s2099_s18   ;;  %s1703_s17 = sphi %s1755_s17, %s2098_s17   ;;  %s1699_s16 = sphi %s1753_s16, %s2097_s16   ;;  %s1695_s15 = sphi %s1751_s15, %s2096_s15  }
   0xa   : > { %p62_p0 = scmp.ne.s32.totalorder %s1699_s16, %s1695_s15  ;;  %p1785_p1 = scmp.eq.s32.totalorder %s1233_s21, 0 }
   0xb   : > { %p1789_p2 = scmp.eq.s32.totalorder %s1233_s21, 7  ;;  %p174_p3 = scmp.eq.s32.totalorder %s1234_s22, 7 }
   0xc   : > { %p1795_p4 = por %p1785_p1, %p62_p0  ;;  %p1235_p5 = scmp.ge.s32.totalorder %s1715_s20, 1 }
   0xd   : > { %p1800_p6 = por %p174_p3, %p62_p0  ;;  %p181_p7 = scmp.lt.s32.totalorder %s1715_s20, 9 }
   0xe   : > { %s1717_s28 = smov [#allocation6]   ;;  %s40_s5 = sadd.s32 1, %s1711_s19 }
   0xf   : > { %s2087_s26 = scalar_select %p1800_p6, 1, 0 }
  0x10   : > { %p1805_p8 = pnand %p1235_p5, %p181_p7  ;;  %s197_s29 = sshll.u32 %s1717_s28, 4  ;;  %s198_s29 = int_to_ptr.vmem [resolvable:$true] %s197_s29 }
  0x11   : > { %s1588_s6 = scalar_lea.vmem %s198_s29, 2048  ;;  %p1596_p3 = scmp.lt.s32.totalorder %s198_s29, %s198_s29 }
  0x12   : > { %p1442_p9 = pneg %p1805_p8  ;;  %p1589_p12 = scmp.ne.s32.totalorder %s198_s29, %s1588_s6 }
  0x13   : > { %p1597_p5 = scmp.lt.s32.totalorder %s1588_s6, %s1588_s6 }
  0x14   : > { %p1813_p10 = pnand %p1442_p9, %p1785_p1 }
  0x15   : > { %p1598_p7 = por %p1597_p5, %p1596_p3 }
  0x16   : > { %p1579_p11 = pneg %p1813_p10 }
  0x18   : > { %p1591_p13 = pnand %p1589_p12, %p1579_p11 }
  0x1a   : > { %p1592_p0 = pneg %p1591_p13 }
  0x1c   : > { %p1599_p6 = pnand %p1598_p7, %p1592_p0 }
  0x1e   : > { %1602 = shalt.err (!%p1599_p6)
}
  0x1f   : > { %s1718_s7 = smov 64   ;;  %s1719_s8 = smov 4  }
  0x20   : > { %s2090_s1 = sld [smem:[#allocation12_spill]]  ;;  %p42_p9 = scmp.ge.s32.totalorder %s40_s5, 8 }
  0x21   : > { %s49_s11 = sadd.s32 1, %s1703_s17  ;;  %p56_p6 = scmp.ne.s32.totalorder %s1703_s17, %s1699_s16 }
  0x22   : > { %p57_p11 = scmp.eq.s32.totalorder %s1715_s20, 0  ;;  %s2102_s5 = smov (%p42_p9, %s40_s5), 0 }
  0x23   : > { %p1837_p13 = por %p1789_p2, %p56_p6  ;;  %s44_s14 = ssub.s32 %s1711_s19, %s2102_s5 }
  0x24   : > { %p1831_p12 = por %p57_p11, %p56_p6  ;;  %p1455_p0 = scmp.lt.s32.totalorder %s1715_s20, 8 }
  0x25   : > { %s2092_s13 = scalar_select %p1837_p13, 1, 0 }
  0x26   : > { %1445 = dma.hbm_to_vmem [thread:$0]  (!%p1813_p10), %s2090_s1, 2048, %s198_s29, [#allocation7], %s1718_s7, %s1718_s7, %s1719_s8  }
  0x27   : > { %p47_p10 = scmp.eq.s32.totalorder %s44_s14, 0  ;;  %s223_s21 = sand.u32 1, %s1703_s17  }
  0x28   : > { %s1240_s22 = sshll.u32 %s223_s21, 8  ;;  %s1304_s29 = sshll.u32 %s1711_s19, 12 }
  0x29   : > { %s1846_s28 = scalar_select %p47_p10, %s1703_s17, %s49_s11  }
  0x2a   : > { %s236_s7 = scalar_lea.hbm %s2077_s0, %s1304_s29  ;;  %s227_s8 = scalar_lea.vmem [#allocation3], %s1240_s22 }
  0x2b   : > { %s237_s9 = sshll.u32 %s227_s8, 4  ;;  %p1854_p2 = pnand %p1455_p0, %p1831_p12  ;;  %s238_s9 = int_to_ptr.vmem [resolvable:$true] %s237_s9 }
  0x2c   : > { %s224_s10 = scalar_lea.sflag [#allocation4], %s223_s21  ;;  %s1616_s14 = scalar_lea.vmem %s238_s9, 4096 }
  0x2d   : > { %p1605_p3 = pneg %p1854_p2  ;;  %p1617_p5 = scmp.ne.s32.totalorder %s238_s9, %s1616_s14 }
  0x2e   : > { %s1720_s11 = smov [#allocation3]  }
  0x2f   : > { %p1619_p7 = pnand %p1617_p5, %p1605_p3  ;;  %s1621_s1 = sshll.u32 %s1720_s11, 4  ;;  %s1622_s1 = int_to_ptr.vmem [resolvable:$false] %s1621_s1 }
  0x30   : > { %s1623_s29 = scalar_lea.vmem %s1622_s1, 8192  ;;  %p1624_p6 = scmp.lt.s32.totalorder %s238_s9, %s1622_s1 }
  0x31   : > { %p1620_p9 = pneg %p1619_p7  ;;  %p1625_p11 = scmp.lt.s32.totalorder %s1623_s29, %s1616_s14 }
  0x33   : > { %p1626_p10 = por %p1625_p11, %p1624_p6 }
  0x35   : > { %p1627_p13 = pnand %p1626_p10, %p1620_p9 }
  0x37   : > { %1630 = shalt.err (!%p1627_p13)
}
  0x38   : > { %s1721_s12 = smov 128   ;;  %s1722_s22 = smov 8  }
  0x39   : > { %1449 = dma.hbm_to_vmem [thread:$0]  (!%p1854_p2), %s236_s7, 4096, %s238_s9, %s224_s10, %s1721_s12, %s1721_s12, %s1722_s22  }
  0x3a   : > { %249 = sbr.rel (%p1805_p8) target bundleno = 376 (0x178), region = 36  ;;  %s1865_s21 = sand.u32 (!%p1805_p8), 1, %s1699_s16  }
  0x3b   : > { %s1245_s1 = sshll.u32 (!%p1805_p8), %s1865_s21, 8  ;;  %s252_s30 = scalar_lea.sflag (!%p1805_p8), [#allocation4], %s1865_s21 }
  0x3c   : > { %s1871_s6 = scalar_lea.vmem (!%p1805_p8), [#allocation3], %s1245_s1 }
  0x3f   : > { %1682 = dma.done.wait (%p1795_p4), %s252_s30, 4096  }
  0x40   : > { %1684 = vsyncadd (%p1795_p4), %s252_s30, 4294963200 }
  0x41   : > { %1686 = dma.done.wait (%p1785_p1), [#allocation7], 2048  }
  0x42   : > { %1688 = vsyncadd (%p1785_p1), [#allocation7], 4294965248  ;;  %v1513_v0 = vld [vmem:[#allocation6 + $0x78] sm:$0xff]   ;;  %v1515_v2 = vld [vmem:[#allocation6 + $0x70] sm:$0xff]   ;;  %s1931_s8 = scalar_lea.vmem [#allocation8], %s1245_s1  ;;  %s1305_s9 = sshll.u32 %s1707_s18, 12 }
  0x43   : > { %v1514_v1 = vld [vmem:[#allocation6 + $0x38] sm:$0xff]   ;;  %1306 = vmatprep.subr.bf16.mxu0 %v1513_v0  ;;  %1418 = vmatprep.subr.bf16.mxu1 %v1513_v0  ;;  %v1516_v3 = vld [vmem:[#allocation6 + $0x30] sm:$0xff]   ;;  %v1517_v4 = vld [vmem:[#allocation6 + $0x68] sm:$0xff]   ;;  %s1106_s24 = sshll.u32 %s1931_s8, 4  ;;  %s2026_s11 = scalar_lea.hbm %s2081_s4, %s1305_s9  ;;  %s2028_s24 = int_to_ptr.vmem [resolvable:$true] %s1106_s24 }
  0x44   : > { %1307 = vmatpush3.bf16.msra.mxu0 %v1514_v1  ;;  %1426 = vmatpush3.bf16.msra.mxu1 %v1514_v1  ;;  %v1518_v5 = vld [vmem:[#allocation6 + $0x28] sm:$0xff]   ;;  %v1519_v6 = vld [vmem:[#allocation6 + $0x60] sm:$0xff]   ;;  %v1521_v8 = vld [vmem:[#allocation6 + $0x58] sm:$0xff]   ;;  %s1092_s18 = scalar_lea.sflag [#allocation5], %s1865_s21  ;;  %s1631_s29 = scalar_lea.vmem %s2028_s24, 4096 }
  0x45   : > { %1308 = vmatprep.subr.bf16.mxu0 %v1515_v2  ;;  %1419 = vmatprep.subr.bf16.mxu1 %v1515_v2  ;;  %v1520_v7 = vld [vmem:[#allocation6 + $0x20] sm:$0xff]   ;;  %v1522_v9 = vld [vmem:[#allocation6 + $0x18] sm:$0xff]   ;;  %v1523_v10 = vld [vmem:[#allocation6 + $0x50] sm:$0xff]   ;;  %p1632_p1 = scmp.ne.s32.totalorder %s2028_s24, %s1631_s29  ;;  %p2094_p4 = scmp.ne.s32.totalorder %s2092_s13, 0 }
  0x46   : > { %v1531_v11 = vld [vmem:[%s1871_s6 + $0x4] ss:$8 sps:$4 sm:$0xff]   ;;  %v1524_v13 = vld [vmem:[#allocation6 + $0x10] sm:$0xff]   ;;  %v1529_v18 = vld [vmem:[%s1871_s6] ss:$8 sps:$4 sm:$0xff]   ;;  %s1723_s12 = smov [#allocation8]  }
  0x47   : > { %v1534_v12 = vld [vmem:[%s1871_s6 + $0x84] ss:$8 sps:$4 sm:$0xff]   ;;  %721 = vmatprep.mubr.bf16.mxu0 %v1531_v11  ;;  %v1532_v19 = vld [vmem:[%s1871_s6 + $0x80] ss:$8 sps:$4 sm:$0xff]   ;;  %v1535_v20 = vld [vmem:[%s1871_s6 + $0x14] ss:$8 sps:$4 sm:$0xff]   ;;  %p1633_p8 = pnand %p1632_p1, %p2094_p4 }
  0x48   : > { %1309 = vmatpush3.bf16.msra.mxu0 %v1516_v3  ;;  %1427 = vmatpush3.bf16.msra.mxu1 %v1516_v3  ;;  %v1525_v14 = vld [vmem:[#allocation6 + $0x48] sm:$0xff]   ;;  %v1527_v16 = vld [vmem:[#allocation6 + $0x40] sm:$0xff]   ;;  %v1537_v21 = vld [vmem:[%s1871_s6 + $0x94] ss:$8 sps:$4 sm:$0xff]   ;;  %s1635_s22 = sshll.u32 %s1723_s12, 4  ;;  %s1636_s22 = int_to_ptr.vmem [resolvable:$false] %s1635_s22 }
  0x49   : > { %1310 = vmatprep.subr.bf16.mxu0 %v1517_v4  ;;  %1420 = vmatprep.subr.bf16.mxu1 %v1517_v4  ;;  %v1526_v15 = vld [vmem:[#allocation6 + $0x8] sm:$0xff]   ;;  %v1528_v17 = vld [vmem:[#allocation6] sm:$0xff]   ;;  %v1539_v22 = vld [vmem:[%s1871_s6 + $0x10] ss:$8 sps:$4 sm:$0xff]   ;;  %p1634_p12 = pneg %p1633_p8  ;;  %s1637_s1 = scalar_lea.vmem %s1636_s22, 8192 }
  0x4a   : > { %785 = vmatprep.mubr.bf16.mxu1 %v1534_v12  ;;  %v1540_v23 = vld [vmem:[%s1871_s6 + $0x90] ss:$8 sps:$4 sm:$0xff]   ;;  %v1541_v24 = vld [vmem:[%s1871_s6 + $0x24] ss:$8 sps:$4 sm:$0xff]   ;;  %v1545_v26 = vld [vmem:[%s1871_s6 + $0x20] ss:$8 sps:$4 sm:$0xff]   ;;  %p1638_p13 = scmp.lt.s32.totalorder %s2028_s24, %s1636_s22  ;;  %p1639_p0 = scmp.lt.s32.totalorder %s1637_s1, %s1631_s29 }
  0x4b   : > { %v1543_v25 = vld [vmem:[%s1871_s6 + $0xa4] ss:$8 sps:$4 sm:$0xff]   ;;  %v1546_v27 = vld [vmem:[%s1871_s6 + $0xa0] ss:$8 sps:$4 sm:$0xff]   ;;  %v1547_v28 = vld [vmem:[%s1871_s6 + $0x34] ss:$8 sps:$4 sm:$0xff]  }
  0x4c   : > { %1311 = vmatpush3.bf16.msra.mxu0 %v1518_v5  ;;  %1428 = vmatpush3.bf16.msra.mxu1 %v1518_v5  ;;  %v1549_v29 = vld [vmem:[%s1871_s6 + $0xb4] ss:$8 sps:$4 sm:$0xff]   ;;  %v1551_v30 = vld [vmem:[%s1871_s6 + $0x30] ss:$8 sps:$4 sm:$0xff]   ;;  %v1553_v32 = vld [vmem:[%s1871_s6 + $0x44] ss:$8 sps:$4 sm:$0xff]   ;;  %p1640_p2 = por %p1639_p0, %p1638_p13 }
  0x4d   : > { %1312 = vmatprep.subr.bf16.mxu0 %v1519_v6  ;;  %1421 = vmatprep.subr.bf16.mxu1 %v1519_v6  ;;  %v1552_v31 = vld [vmem:[%s1871_s6 + $0xb0] ss:$8 sps:$4 sm:$0xff]   ;;  %v1555_v33 = vld [vmem:[%s1871_s6 + $0xc4] ss:$8 sps:$4 sm:$0xff]   ;;  %v1557_v34 = vld [vmem:[%s1871_s6 + $0x40] ss:$8 sps:$4 sm:$0xff]  }
  0x4e   : > { %v1558_v35 = vld [vmem:[%s1871_s6 + $0xc0] ss:$8 sps:$4 sm:$0xff]   ;;  %v1559_v36 = vld [vmem:[%s1871_s6 + $0x54] ss:$8 sps:$4 sm:$0xff]   ;;  %v1563_v38 = vld [vmem:[%s1871_s6 + $0x50] ss:$8 sps:$4 sm:$0xff]   ;;  %p1641_p3 = pnand %p1640_p2, %p1634_p12 }
  0x4f   : > { %v1561_v37 = vld [vmem:[%s1871_s6 + $0xd4] ss:$8 sps:$4 sm:$0xff]   ;;  %v1564_v39 = vld [vmem:[%s1871_s6 + $0xd0] ss:$8 sps:$4 sm:$0xff]   ;;  %v1565_v40 = vld [vmem:[%s1871_s6 + $0x64] ss:$8 sps:$4 sm:$0xff]  }
  0x50   : > { %1313 = vmatpush3.bf16.msra.mxu0 %v1520_v7  ;;  %1429 = vmatpush3.bf16.msra.mxu1 %v1520_v7  ;;  %v1567_v41 = vld [vmem:[%s1871_s6 + $0xe4] ss:$8 sps:$4 sm:$0xff]   ;;  %v1569_v42 = vld [vmem:[%s1871_s6 + $0x60] ss:$8 sps:$4 sm:$0xff]   ;;  %v1571_v44 = vld [vmem:[%s1871_s6 + $0x74] ss:$8 sps:$4 sm:$0xff]  }
  0x51   : > { %1314 = vmatprep.subr.bf16.mxu0 %v1521_v8  ;;  %1422 = vmatprep.subr.bf16.mxu1 %v1521_v8  ;;  %v1570_v43 = vld [vmem:[%s1871_s6 + $0xe0] ss:$8 sps:$4 sm:$0xff]   ;;  %v1573_v45 = vld [vmem:[%s1871_s6 + $0xf4] ss:$8 sps:$4 sm:$0xff]   ;;  %v1575_v46 = vld [vmem:[%s1871_s6 + $0x70] ss:$8 sps:$4 sm:$0xff]  }
  0x52   : > { %v1576_v47 = vld [vmem:[%s1871_s6 + $0xf0] ss:$8 sps:$4 sm:$0xff]   ;;  %v1916_v51 = vld [vmem:[%s2079_s2] ss:$0 sm:$0xff] }
  0x53   : > { %v1921_v55 = vld [vmem:[%s2080_s3] ss:$0 sm:$0xff] }
  0x54   : > { %1315 = vmatpush3.bf16.msra.mxu0 %v1522_v9  ;;  %1430 = vmatpush3.bf16.msra.mxu1 %v1522_v9 }
  0x55   : > { %1316 = vmatprep.subr.bf16.mxu0 %v1523_v10  ;;  %1423 = vmatprep.subr.bf16.mxu1 %v1523_v10 }
  0x58   : > { %1317 = vmatpush3.bf16.msra.mxu0 %v1524_v13  ;;  %1431 = vmatpush3.bf16.msra.mxu1 %v1524_v13 }
  0x59   : > { %1318 = vmatprep.subr.bf16.mxu0 %v1525_v14  ;;  %1424 = vmatprep.subr.bf16.mxu1 %v1525_v14 }
  0x5c   : > { %1319 = vmatpush3.bf16.msra.mxu0 %v1526_v15  ;;  %1432 = vmatpush3.bf16.msra.mxu1 %v1526_v15 }
  0x5d   : > { %1320 = vmatprep.subr.bf16.mxu0 %v1527_v16  ;;  %1425 = vmatprep.subr.bf16.mxu1 %v1527_v16 }
  0x60   : > { %1321 = vmatpush3.bf16.msra.mxu0 %v1528_v17  ;;  %1433 = vmatpush3.bf16.msra.mxu1 %v1528_v17 }
  0x63   : > { %722 = vmatmul.mubr.bf16.vlgmr.msra.gmra.mxu0 %v1529_v18  ;;  %786 = vmatmul.mubr.bf16.vlgmr.msra.gmra.mxu1 %v1532_v19 }
  0x64   : > { %729 = vmatprep.mubr.bf16.mxu0 %v1535_v20  ;;  %793 = vmatprep.mubr.bf16.mxu1 %v1537_v21 }
  0x6b   : > { %730 = vmatmul.mubr.bf16.gmra.mxu0 %v1539_v22  ;;  %794 = vmatmul.mubr.bf16.gmra.mxu1 %v1540_v23 }
  0x6c   : > { %737 = vmatprep.mubr.bf16.mxu0 %v1541_v24  ;;  %801 = vmatprep.mubr.bf16.mxu1 %v1543_v25 }
  0x73   : > { %738 = vmatmul.mubr.bf16.gmra.mxu0 %v1545_v26  ;;  %802 = vmatmul.mubr.bf16.gmra.mxu1 %v1546_v27 }
  0x74   : > { %745 = vmatprep.mubr.bf16.mxu0 %v1547_v28  ;;  %809 = vmatprep.mubr.bf16.mxu1 %v1549_v29 }
  0x7b   : > { %746 = vmatmul.mubr.bf16.gmra.mxu0 %v1551_v30  ;;  %810 = vmatmul.mubr.bf16.gmra.mxu1 %v1552_v31 }
  0x7c   : > { %753 = vmatprep.mubr.bf16.mxu0 %v1553_v32  ;;  %817 = vmatprep.mubr.bf16.mxu1 %v1555_v33 }
  0x83   : > { %754 = vmatmul.mubr.bf16.gmra.mxu0 %v1557_v34  ;;  %818 = vmatmul.mubr.bf16.gmra.mxu1 %v1558_v35 }
  0x84   : > { %761 = vmatprep.mubr.bf16.mxu0 %v1559_v36  ;;  %825 = vmatprep.mubr.bf16.mxu1 %v1561_v37 }
  0x8b   : > { %762 = vmatmul.mubr.bf16.gmra.mxu0 %v1563_v38  ;;  %826 = vmatmul.mubr.bf16.gmra.mxu1 %v1564_v39 }
  0x8c   : > { %769 = vmatprep.mubr.bf16.mxu0 %v1565_v40  ;;  %833 = vmatprep.mubr.bf16.mxu1 %v1567_v41 }
  0x93   : > { %770 = vmatmul.mubr.bf16.gmra.mxu0 %v1569_v42  ;;  %834 = vmatmul.mubr.bf16.gmra.mxu1 %v1570_v43 }
  0x94   : > { %777 = vmatprep.mubr.bf16.mxu0 %v1571_v44  ;;  %841 = vmatprep.mubr.bf16.mxu1 %v1573_v45 }
  0x9b   : > { %778 = vmatmul.mubr.bf16.gmra.mxu0 %v1575_v46  ;;  %842 = vmatmul.mubr.bf16.gmra.mxu1 %v1576_v47 }
 0x123   : > { %v1322_v48 = vpop.f32.mrf.mxu0  ;;  %v1370_v49 = vpop.f32.mrf.mxu1 }
 0x125   : > { %v1323_v50 = vpop.f32.mrf.mxu0  ;;  %v1371_v52 = vpop.f32.mrf.mxu1 }
 0x126   : > { %v1324_v53 = vadd.f32 %v1323_v50, %v1322_v48  ;;  %v1372_v54 = vadd.f32 %v1371_v52, %v1370_v49 }
 0x127   : > { %v1325_v56 = vpop.f32.mrf.mxu0  ;;  %v1373_v57 = vpop.f32.mrf.mxu1 }
 0x128   : > { %v956_v58 = vmul.f32 %v1324_v53, %v1916_v51  ;;  %v972_v59 = vmul.f32 %v1372_v54, %v1916_v51 }
 0x129   : > { %v1326_v60 = vpop.f32.mrf.mxu0  ;;  %v1374_v61 = vpop.f32.mrf.mxu1 }
 0x12a   : > { %v995_v62 = vadd.f32 %v1921_v55, %v956_v58  ;;  %v1011_v63 = vadd.f32 %v1921_v55, %v972_v59  ;;  %v1327_v0 = vadd.f32 %v1326_v60, %v1325_v56  ;;  %v1375_v1 = vadd.f32 %v1374_v61, %v1373_v57 }
 0x12b   : > { %v1328_v2 = vpop.f32.mrf.mxu0  ;;  %v1376_v3 = vpop.f32.mrf.mxu1 }
 0x12c   : > { %v1027_v4 = vmax.f32 %v995_v62, 0.0  ;;  %v1043_v5 = vmax.f32 %v1011_v63, 0.0  ;;  %v957_v6 = vmul.f32 %v1327_v0, %v1916_v51  ;;  %v973_v7 = vmul.f32 %v1375_v1, %v1916_v51 }
 0x12d   : > { %v1329_v8 = vpop.f32.mrf.mxu0  ;;  %v1377_v9 = vpop.f32.mrf.mxu1 }
 0x12e   : > { %1059 = vst [vmem:[%s1931_s8] sm:$0xff] %v1027_v4  ;;  %1075 = vst [vmem:[%s1931_s8 + $0x80] sm:$0xff] %v1043_v5  ;;  %v996_v10 = vadd.f32 %v1921_v55, %v957_v6  ;;  %v1012_v11 = vadd.f32 %v1921_v55, %v973_v7  ;;  %v1330_v12 = vadd.f32 %v1329_v8, %v1328_v2 }
 0x12f   : > { %v1378_v13 = vadd.f32 %v1377_v9, %v1376_v3  ;;  %v1331_v14 = vpop.f32.mrf.mxu0  ;;  %v1379_v15 = vpop.f32.mrf.mxu1 }
 0x130   : > { %v1028_v16 = vmax.f32 %v996_v10, 0.0  ;;  %v1044_v17 = vmax.f32 %v1012_v11, 0.0  ;;  %v958_v18 = vmul.f32 %v1330_v12, %v1916_v51 }
 0x131   : > { %v974_v19 = vmul.f32 %v1378_v13, %v1916_v51  ;;  %v1332_v20 = vpop.f32.mrf.mxu0  ;;  %v1380_v21 = vpop.f32.mrf.mxu1 }
 0x132   : > { %1060 = vst [vmem:[%s1931_s8 + $0x8] sm:$0xff] %v1028_v16  ;;  %1076 = vst [vmem:[%s1931_s8 + $0x88] sm:$0xff] %v1044_v17  ;;  %v997_v22 = vadd.f32 %v1921_v55, %v958_v18  ;;  %v1333_v24 = vadd.f32 %v1332_v20, %v1331_v14  ;;  %v1381_v25 = vadd.f32 %v1380_v21, %v1379_v15 }
 0x133   : > { %v1013_v23 = vadd.f32 %v1921_v55, %v974_v19  ;;  %v1334_v26 = vpop.f32.mrf.mxu0  ;;  %v1382_v27 = vpop.f32.mrf.mxu1 }
 0x134   : > { %v1029_v28 = vmax.f32 %v997_v22, 0.0  ;;  %v959_v30 = vmul.f32 %v1333_v24, %v1916_v51  ;;  %v975_v31 = vmul.f32 %v1381_v25, %v1916_v51 }
 0x135   : > { %v1045_v29 = vmax.f32 %v1013_v23, 0.0  ;;  %v1335_v32 = vpop.f32.mrf.mxu0  ;;  %v1383_v33 = vpop.f32.mrf.mxu1 }
 0x136   : > { %1061 = vst [vmem:[%s1931_s8 + $0x10] sm:$0xff] %v1029_v28  ;;  %v998_v34 = vadd.f32 %v1921_v55, %v959_v30  ;;  %v1014_v35 = vadd.f32 %v1921_v55, %v975_v31  ;;  %v1336_v36 = vadd.f32 %v1335_v32, %v1334_v26  ;;  %v1384_v37 = vadd.f32 %v1383_v33, %v1382_v27 }
 0x137   : > { %1077 = vst [vmem:[%s1931_s8 + $0x90] sm:$0xff] %v1045_v29  ;;  %v1337_v38 = vpop.f32.mrf.mxu0  ;;  %v1385_v39 = vpop.f32.mrf.mxu1 }
 0x138   : > { %v1030_v40 = vmax.f32 %v998_v34, 0.0  ;;  %v1046_v41 = vmax.f32 %v1014_v35, 0.0  ;;  %v960_v42 = vmul.f32 %v1336_v36, %v1916_v51  ;;  %v976_v43 = vmul.f32 %v1384_v37, %v1916_v51 }
 0x139   : > { %v1338_v44 = vpop.f32.mrf.mxu0  ;;  %v1386_v45 = vpop.f32.mrf.mxu1 }
 0x13a   : > { %1062 = vst [vmem:[%s1931_s8 + $0x18] sm:$0xff] %v1030_v40  ;;  %1078 = vst [vmem:[%s1931_s8 + $0x98] sm:$0xff] %v1046_v41  ;;  %v999_v46 = vadd.f32 %v1921_v55, %v960_v42  ;;  %v1015_v47 = vadd.f32 %v1921_v55, %v976_v43  ;;  %v1339_v48 = vadd.f32 %v1338_v44, %v1337_v38 }
 0x13b   : > { %v1387_v49 = vadd.f32 %v1386_v45, %v1385_v39  ;;  %v1340_v50 = vpop.f32.mrf.mxu0  ;;  %v1388_v52 = vpop.f32.mrf.mxu1 }
 0x13c   : > { %v1031_v53 = vmax.f32 %v999_v46, 0.0  ;;  %v1047_v54 = vmax.f32 %v1015_v47, 0.0  ;;  %v961_v56 = vmul.f32 %v1339_v48, %v1916_v51 }
 0x13d   : > { %v977_v57 = vmul.f32 %v1387_v49, %v1916_v51  ;;  %v1341_v58 = vpop.f32.mrf.mxu0  ;;  %v1389_v59 = vpop.f32.mrf.mxu1 }
 0x13e   : > { %1063 = vst [vmem:[%s1931_s8 + $0x20] sm:$0xff] %v1031_v53  ;;  %1079 = vst [vmem:[%s1931_s8 + $0xa0] sm:$0xff] %v1047_v54  ;;  %v1000_v60 = vadd.f32 %v1921_v55, %v961_v56  ;;  %v1342_v62 = vadd.f32 %v1341_v58, %v1340_v50  ;;  %v1390_v63 = vadd.f32 %v1389_v59, %v1388_v52 }
 0x13f   : > { %v1016_v61 = vadd.f32 %v1921_v55, %v977_v57  ;;  %v1343_v0 = vpop.f32.mrf.mxu0  ;;  %v1391_v1 = vpop.f32.mrf.mxu1 }
 0x140   : > { %v1032_v2 = vmax.f32 %v1000_v60, 0.0  ;;  %v962_v4 = vmul.f32 %v1342_v62, %v1916_v51  ;;  %v978_v5 = vmul.f32 %v1390_v63, %v1916_v51 }
 0x141   : > { %v1048_v3 = vmax.f32 %v1016_v61, 0.0  ;;  %v1344_v6 = vpop.f32.mrf.mxu0  ;;  %v1392_v7 = vpop.f32.mrf.mxu1 }
 0x142   : > { %1064 = vst [vmem:[%s1931_s8 + $0x28] sm:$0xff] %v1032_v2  ;;  %v1001_v8 = vadd.f32 %v1921_v55, %v962_v4  ;;  %v1017_v9 = vadd.f32 %v1921_v55, %v978_v5  ;;  %v1345_v10 = vadd.f32 %v1344_v6, %v1343_v0  ;;  %v1393_v11 = vadd.f32 %v1392_v7, %v1391_v1 }
 0x143   : > { %1080 = vst [vmem:[%s1931_s8 + $0xa8] sm:$0xff] %v1048_v3  ;;  %v1346_v12 = vpop.f32.mrf.mxu0  ;;  %v1394_v13 = vpop.f32.mrf.mxu1 }
 0x144   : > { %v1033_v14 = vmax.f32 %v1001_v8, 0.0  ;;  %v1049_v15 = vmax.f32 %v1017_v9, 0.0  ;;  %v963_v16 = vmul.f32 %v1345_v10, %v1916_v51  ;;  %v979_v17 = vmul.f32 %v1393_v11, %v1916_v51 }
 0x145   : > { %v1347_v18 = vpop.f32.mrf.mxu0  ;;  %v1395_v19 = vpop.f32.mrf.mxu1 }
 0x146   : > { %1065 = vst [vmem:[%s1931_s8 + $0x30] sm:$0xff] %v1033_v14  ;;  %1081 = vst [vmem:[%s1931_s8 + $0xb0] sm:$0xff] %v1049_v15  ;;  %v1002_v20 = vadd.f32 %v1921_v55, %v963_v16  ;;  %v1018_v21 = vadd.f32 %v1921_v55, %v979_v17  ;;  %v1348_v22 = vadd.f32 %v1347_v18, %v1346_v12 }
 0x147   : > { %v1396_v23 = vadd.f32 %v1395_v19, %v1394_v13  ;;  %v1349_v24 = vpop.f32.mrf.mxu0  ;;  %v1397_v25 = vpop.f32.mrf.mxu1 }
 0x148   : > { %v1034_v26 = vmax.f32 %v1002_v20, 0.0  ;;  %v1050_v27 = vmax.f32 %v1018_v21, 0.0  ;;  %v964_v28 = vmul.f32 %v1348_v22, %v1916_v51 }
 0x149   : > { %v980_v29 = vmul.f32 %v1396_v23, %v1916_v51  ;;  %v1350_v30 = vpop.f32.mrf.mxu0  ;;  %v1398_v31 = vpop.f32.mrf.mxu1 }
 0x14a   : > { %1066 = vst [vmem:[%s1931_s8 + $0x38] sm:$0xff] %v1034_v26  ;;  %1082 = vst [vmem:[%s1931_s8 + $0xb8] sm:$0xff] %v1050_v27  ;;  %v1003_v32 = vadd.f32 %v1921_v55, %v964_v28  ;;  %v1351_v34 = vadd.f32 %v1350_v30, %v1349_v24  ;;  %v1399_v35 = vadd.f32 %v1398_v31, %v1397_v25 }
 0x14b   : > { %v1019_v33 = vadd.f32 %v1921_v55, %v980_v29  ;;  %v1352_v36 = vpop.f32.mrf.mxu0  ;;  %v1400_v37 = vpop.f32.mrf.mxu1 }
 0x14c   : > { %v1035_v38 = vmax.f32 %v1003_v32, 0.0  ;;  %v965_v40 = vmul.f32 %v1351_v34, %v1916_v51  ;;  %v981_v41 = vmul.f32 %v1399_v35, %v1916_v51 }
 0x14d   : > { %v1051_v39 = vmax.f32 %v1019_v33, 0.0  ;;  %v1353_v42 = vpop.f32.mrf.mxu0  ;;  %v1401_v43 = vpop.f32.mrf.mxu1 }
 0x14e   : > { %1067 = vst [vmem:[%s1931_s8 + $0x40] sm:$0xff] %v1035_v38  ;;  %v1004_v44 = vadd.f32 %v1921_v55, %v965_v40  ;;  %v1020_v45 = vadd.f32 %v1921_v55, %v981_v41  ;;  %v1354_v46 = vadd.f32 %v1353_v42, %v1352_v36  ;;  %v1402_v47 = vadd.f32 %v1401_v43, %v1400_v37 }
 0x14f   : > { %1083 = vst [vmem:[%s1931_s8 + $0xc0] sm:$0xff] %v1051_v39  ;;  %v1355_v48 = vpop.f32.mrf.mxu0  ;;  %v1403_v49 = vpop.f32.mrf.mxu1 }
 0x150   : > { %v1036_v50 = vmax.f32 %v1004_v44, 0.0  ;;  %v1052_v52 = vmax.f32 %v1020_v45, 0.0  ;;  %v966_v53 = vmul.f32 %v1354_v46, %v1916_v51  ;;  %v982_v54 = vmul.f32 %v1402_v47, %v1916_v51 }
 0x151   : > { %v1356_v56 = vpop.f32.mrf.mxu0  ;;  %v1404_v57 = vpop.f32.mrf.mxu1 }
 0x152   : > { %1068 = vst [vmem:[%s1931_s8 + $0x48] sm:$0xff] %v1036_v50  ;;  %1084 = vst [vmem:[%s1931_s8 + $0xc8] sm:$0xff] %v1052_v52  ;;  %v1005_v58 = vadd.f32 %v1921_v55, %v966_v53  ;;  %v1021_v59 = vadd.f32 %v1921_v55, %v982_v54  ;;  %v1357_v60 = vadd.f32 %v1356_v56, %v1355_v48 }
 0x153   : > { %v1405_v61 = vadd.f32 %v1404_v57, %v1403_v49  ;;  %v1358_v62 = vpop.f32.mrf.mxu0  ;;  %v1406_v63 = vpop.f32.mrf.mxu1 }
 0x154   : > { %v1037_v0 = vmax.f32 %v1005_v58, 0.0  ;;  %v1053_v1 = vmax.f32 %v1021_v59, 0.0  ;;  %v967_v2 = vmul.f32 %v1357_v60, %v1916_v51 }
 0x155   : > { %v983_v3 = vmul.f32 %v1405_v61, %v1916_v51  ;;  %v1359_v4 = vpop.f32.mrf.mxu0  ;;  %v1407_v5 = vpop.f32.mrf.mxu1 }
 0x156   : > { %1069 = vst [vmem:[%s1931_s8 + $0x50] sm:$0xff] %v1037_v0  ;;  %1085 = vst [vmem:[%s1931_s8 + $0xd0] sm:$0xff] %v1053_v1  ;;  %v1006_v6 = vadd.f32 %v1921_v55, %v967_v2  ;;  %v1360_v8 = vadd.f32 %v1359_v4, %v1358_v62  ;;  %v1408_v9 = vadd.f32 %v1407_v5, %v1406_v63 }
 0x157   : > { %v1022_v7 = vadd.f32 %v1921_v55, %v983_v3  ;;  %v1361_v10 = vpop.f32.mrf.mxu0  ;;  %v1409_v11 = vpop.f32.mrf.mxu1 }
 0x158   : > { %v1038_v12 = vmax.f32 %v1006_v6, 0.0  ;;  %v968_v14 = vmul.f32 %v1360_v8, %v1916_v51  ;;  %v984_v15 = vmul.f32 %v1408_v9, %v1916_v51 }
 0x159   : > { %v1054_v13 = vmax.f32 %v1022_v7, 0.0  ;;  %v1362_v16 = vpop.f32.mrf.mxu0  ;;  %v1410_v17 = vpop.f32.mrf.mxu1 }
 0x15a   : > { %1070 = vst [vmem:[%s1931_s8 + $0x58] sm:$0xff] %v1038_v12  ;;  %v1007_v18 = vadd.f32 %v1921_v55, %v968_v14  ;;  %v1023_v19 = vadd.f32 %v1921_v55, %v984_v15  ;;  %v1363_v20 = vadd.f32 %v1362_v16, %v1361_v10  ;;  %v1411_v21 = vadd.f32 %v1410_v17, %v1409_v11 }
 0x15b   : > { %1086 = vst [vmem:[%s1931_s8 + $0xd8] sm:$0xff] %v1054_v13  ;;  %v1364_v22 = vpop.f32.mrf.mxu0  ;;  %v1412_v23 = vpop.f32.mrf.mxu1 }
 0x15c   : > { %v1039_v24 = vmax.f32 %v1007_v18, 0.0  ;;  %v1055_v25 = vmax.f32 %v1023_v19, 0.0  ;;  %v969_v26 = vmul.f32 %v1363_v20, %v1916_v51  ;;  %v985_v27 = vmul.f32 %v1411_v21, %v1916_v51 }
 0x15d   : > { %v1365_v28 = vpop.f32.mrf.mxu0  ;;  %v1413_v29 = vpop.f32.mrf.mxu1 }
 0x15e   : > { %1071 = vst [vmem:[%s1931_s8 + $0x60] sm:$0xff] %v1039_v24  ;;  %1087 = vst [vmem:[%s1931_s8 + $0xe0] sm:$0xff] %v1055_v25  ;;  %v1008_v30 = vadd.f32 %v1921_v55, %v969_v26  ;;  %v1024_v31 = vadd.f32 %v1921_v55, %v985_v27  ;;  %v1366_v32 = vadd.f32 %v1365_v28, %v1364_v22 }
 0x15f   : > { %v1414_v33 = vadd.f32 %v1413_v29, %v1412_v23  ;;  %v1367_v34 = vpop.f32.mrf.mxu0  ;;  %v1415_v35 = vpop.f32.mrf.mxu1 }
 0x160   : > { %v1040_v36 = vmax.f32 %v1008_v30, 0.0  ;;  %v1056_v37 = vmax.f32 %v1024_v31, 0.0  ;;  %v970_v38 = vmul.f32 %v1366_v32, %v1916_v51 }
 0x161   : > { %v986_v39 = vmul.f32 %v1414_v33, %v1916_v51  ;;  %v1368_v40 = vpop.f32.mrf.mxu0  ;;  %v1416_v41 = vpop.f32.mrf.mxu1 }
 0x162   : > { %1072 = vst [vmem:[%s1931_s8 + $0x68] sm:$0xff] %v1040_v36  ;;  %1088 = vst [vmem:[%s1931_s8 + $0xe8] sm:$0xff] %v1056_v37  ;;  %v1009_v42 = vadd.f32 %v1921_v55, %v970_v38  ;;  %v1369_v44 = vadd.f32 %v1368_v40, %v1367_v34  ;;  %v1417_v45 = vadd.f32 %v1416_v41, %v1415_v35 }
 0x163   : > { %v1025_v43 = vadd.f32 %v1921_v55, %v986_v39 }
 0x164   : > { %v1041_v46 = vmax.f32 %v1009_v42, 0.0  ;;  %v971_v48 = vmul.f32 %v1369_v44, %v1916_v51  ;;  %v987_v49 = vmul.f32 %v1417_v45, %v1916_v51 }
 0x165   : > { %v1057_v47 = vmax.f32 %v1025_v43, 0.0 }
 0x166   : > { %1073 = vst [vmem:[%s1931_s8 + $0x70] sm:$0xff] %v1041_v46  ;;  %v1010_v50 = vadd.f32 %v1921_v55, %v971_v48  ;;  %v1026_v52 = vadd.f32 %v1921_v55, %v987_v49 }
 0x167   : > { %1089 = vst [vmem:[%s1931_s8 + $0xf0] sm:$0xff] %v1057_v47 }
 0x168   : > { %v1042_v51 = vmax.f32 %v1010_v50, 0.0  ;;  %v1058_v53 = vmax.f32 %v1026_v52, 0.0 }
 0x16a   : > { %1074 = vst [vmem:[%s1931_s8 + $0x78] sm:$0xff] %v1042_v51  ;;  %1090 = vst [vmem:[%s1931_s8 + $0xf8] sm:$0xff] %v1058_v53 }
 0x16b   : > { %1644 = shalt.err (!%p1641_p3)
}
 0x16c   : > { %s1645_s30 = scalar_lea.hbm %s2026_s11, 4096  ;;  %s1649_s25 = scalar_lea.hbm %s2081_s4, 32768 }
 0x16d   : > { %p1646_p5 = scmp.ne.s32.totalorder %s2026_s11, %s1645_s30  ;;  %p1650_p6 = scmp.lt.s32.totalorder %s2026_s11, %s2081_s4 }
 0x16e   : > { %p1651_p11 = scmp.lt.s32.totalorder %s1649_s25, %s1645_s30 }
 0x16f   : > { %p1647_p7 = pnand %p1646_p5, %p2094_p4 }
 0x170   : > { %p1652_p10 = por %p1651_p11, %p1650_p6 }
 0x171   : > { %p1648_p9 = pneg %p1647_p7 }
 0x173   : > { %p1653_p1 = pnand %p1652_p10, %p1648_p9 }
 0x175   : > { %1656 = shalt.err (!%p1653_p1)
}
 0x176   : > { %s1724_s8 = smov 128   ;;  %s1725_s9 = smov 8  }
 0x177   : > { %1440 = dma.vmem_to_hbm [thread:$0]  (%p2094_p4), %s2028_s24, 4096, %s2026_s11, %s1092_s18, %s1724_s8, %s1724_s8, %s1725_s9  }
 0x178 PF: > { %p1457_p8 = scmp.ge.s32.totalorder %s1715_s20, 2  ;;  %s1121_s10 = sand.u32 1, %s1695_s15  }
 0x179   : > { %p2095_p12 = scmp.ne.s32.totalorder %s2087_s26, 0  ;;  %s1122_s14 = scalar_lea.sflag [#allocation5], %s1121_s10 }
 0x17b   : > { %p1451_p13 = pnand %p1457_p8, %p2095_p12 }
 0x17d   : > { %p1452_p0 = pneg %p1451_p13 }
 0x17f   : > { %1690 = dma.done.wait (%p1452_p0), %s1122_s14, 4096  }
 0x180   : > { %1692 = vsyncadd (%p1452_p0), %s1122_s14, 4294963200  ;;  %s21_s20 = sadd.s32 1, %s1715_s20   ;;  %s2096_s15 = smov %s1699_s16 }
 0x181   : > { %p18_p2 = scmp.ge.s32.totalorder %s21_s20, 10   ;;  %s2097_s16 = smov %s1703_s17 }
 0x182   : > { %s2098_s17 = smov %s1846_s28  ;;  %s2099_s18 = smov %s1711_s19 }
 0x183   : > { %s2100_s19 = smov %s2102_s5  ;;  %20 = sbr.rel (!%p18_p2) target bundleno = 9 (0x9), region = 100 }
 0x188   :  { %1127 = vsyncpa [#allocation4], 1 }
 0x189   :  { %1129 = vsyncpa [#allocation4 + $0x1], 1 }
 0x18a   :  { %1130 = vsyncpa [#allocation7], 1 }
 0x18b   :  { %1131 = vsyncpa [#allocation5], 1 }
 0x18c   :  { %1133 = vsyncpa [#allocation5 + $0x1], 1 }

</bundles_post_ra>
